<compile_context>
chip_gen: v7x
topology: tpu7x:2x2x1
jax: 0.10.0
libtpu: 0.0.40
codegen_flags: <defaults>
</compile_context>

<pallas_src>
import functools

import jax
import jax.numpy as jnp
from jax.experimental import pallas as pl
from jax.experimental.pallas import tpu as pltpu


def layernorm_kernel(x_ref, alpha_ref, bias_ref, o_ref, *, eps, inv_h, inv_nm1):
    x = x_ref[...].astype(jnp.float32)                        # (tm, H)
    # Single-pass moments: sum and sum of squares in one sweep over x.
    s = jnp.sum(x, axis=-1, keepdims=True)                    # (tm, 1)
    sq = jnp.sum(x * x, axis=-1, keepdims=True)               # (tm, 1)
    mean = s * inv_h
    # Unbiased (ddof=1) variance: (sum(x^2) - sum(x)^2 / H) / (H - 1).
    # Guard tiny negative values from f32 cancellation before sqrt.
    var = jnp.maximum((sq - s * mean) * inv_nm1, 0.0)
    std = jnp.sqrt(var)
    # Per-row reciprocal (tm values, EUP slot) instead of tm*H divides.
    # Exact (approx=False) so tight tolerances vs the reference hold.
    # eps > 0 also keeps masked edge rows finite (std==0 -> inv = 1/eps).
    inv = pl.reciprocal(std + eps, approx=False)               # (tm, 1)
    alpha = alpha_ref[...].astype(jnp.float32)                 # (1, H)
    bias = bias_ref[...].astype(jnp.float32)                   # (1, H)
    y = (x - mean) * inv * alpha + bias
    o_ref[...] = y.astype(o_ref.dtype)


def _vmem_capacity_bytes():
    try:
        info = pltpu.get_tpu_info()
        cap = int(getattr(info, "vmem_capacity_bytes", 0))
        return cap if cap > 0 else None
    except Exception:
        return None


def _vmem_plan():
    """(budget_bytes for tile sizing, vmem_limit_bytes) per TPU generation."""
    cap = _vmem_capacity_bytes()
    if cap is not None and cap > (96 << 20):
        # 128 MiB VMEM parts (v5e / v6e): go bigger for better roofline.
        return 64 << 20, 96 << 20
    # v7x (64 MiB per-TC VMEM) or unknown: stay conservative.
    return 28 << 20, 38 << 20


def _pick_tile_rows(n_rows, features, itemsize, budget_bytes):
    """Largest row tile that fits the VMEM budget and keeps the pipeline full."""
    # Double-buffered input + output tiles plus ~8 B/elem of f32 temporaries
    # (single-pass moments keep only x live at full width).
    bytes_per_row = features * (4 * itemsize + 8)
    t = budget_bytes // max(bytes_per_row, 1)
    t = min(int(t), 1024)                       # diminishing returns past ~1024
    # Keep >= ~4 grid steps so prefetch/writeback overlap has a steady state and
    # the row axis splits across v7x's 2 TensorCores.
    t = min(t, max((n_rows + 3) // 4, 1))
    t = max(16, (t // 16) * 16)                 # sublane-friendly (f32 & bf16)
    return t


def layer_normalization(x, alpha, bias, eps=1e-6, tile_rows=None):
    """x: (..., H). alpha, bias: (H,)."""
    orig_shape = x.shape
    H = orig_shape[-1]
    x2 = x.reshape(-1, H)
    N = x2.shape[0]

    budget_bytes, vmem_limit = _vmem_plan()
    if tile_rows is None:
        tile_rows = _pick_tile_rows(N, H, jnp.dtype(x.dtype).itemsize, budget_bytes)

    # No padding / slicing: Pallas masks the partial edge block. OOB input rows
    # produce garbage that stays within their own (discarded) rows because all
    # reductions are per-row; OOB output rows are never written to HBM.
    n_blocks = pl.cdiv(N, tile_rows)

    alpha2 = alpha.reshape(1, H)
    bias2 = bias.reshape(1, H)

    kernel = functools.partial(
        layernorm_kernel,
        eps=float(eps),
        inv_h=1.0 / float(H),
        inv_nm1=1.0 / float(max(H - 1, 1)),
    )

    # TODO(synk): for H < 128 (like the demo's H=32) stores are lane-masked; a
    # lane-packing path (k = 128//H rows per vreg row) would make small-H cases
    # lane-dense. Transformer-sized H (multiple of 128) is already dense.
    out = pl.pallas_call(
        kernel,
        out_shape=jax.ShapeDtypeStruct((N, H), x.dtype),
        grid_spec=pltpu.PrefetchScalarGridSpec(
            num_scalar_prefetch=0,
            grid=(n_blocks,),
            in_specs=[
                pl.BlockSpec((tile_rows, H), lambda i: (i, 0)),
                pl.BlockSpec((1, H), lambda i: (0, 0)),
                pl.BlockSpec((1, H), lambda i: (0, 0)),
            ],
            out_specs=pl.BlockSpec((tile_rows, H), lambda i: (i, 0)),
        ),
        compiler_params=pltpu.CompilerParams(
            dimension_semantics=("parallel",),
            vmem_limit_bytes=vmem_limit,
        ),
    )(x2, alpha2, bias2)

    return out.reshape(orig_shape)


def _reference(x, alpha, bias, eps):
    h = x.shape[-1]
    mean = jnp.mean(x, axis=-1, keepdims=True)
    std = jnp.sqrt(jnp.sum((x - mean) ** 2, axis=-1, keepdims=True) / (h - 1))
    return alpha * (x - mean) / (std + eps) + bias


if __name__ == "__main__":
    key = jax.random.PRNGKey(0)
    batch, seq, hidden = 2, 8, 32
    x = jax.random.normal(key, (batch, seq, hidden), dtype=jnp.float32)

    # Deterministic parameter init matching nn.Parameter(torch.ones/zeros(features))
    alpha = jnp.ones((hidden,), dtype=jnp.float32)
    bias = jnp.zeros((hidden,), dtype=jnp.float32)

    y = layer_normalization(x, alpha, bias, eps=1e-6)
    jax.block_until_ready(y)
    ref = _reference(x, alpha, bias, 1e-6)
    assert jnp.allclose(y, ref, atol=1e-5, rtol=1e-5), "mismatch vs reference"

    # Extra check: N not divisible by tile_rows exercises the masked edge block
    # (21 rows, tile_rows=16 -> 2 blocks, second one partial).
    key2 = jax.random.PRNGKey(1)
    x2 = jax.random.normal(key2, (3, 7, hidden), dtype=jnp.float32)
    y2 = layer_normalization(x2, alpha, bias, eps=1e-6)
    jax.block_until_ready(y2)
    ref2 = _reference(x2, alpha, bias, 1e-6)
    assert jnp.allclose(y2, ref2, atol=1e-5, rtol=1e-5), "edge-block mismatch"

    print("KERNEL_OK")
</pallas_src>

<mosaic_0001>
module attributes {stable_mosaic.version = 11 : i64} {
  func.func @layernorm_kernel(%arg0: i32, %arg1: memref<16x32xf32, #tpu.memory_space<vmem>>, %arg2: memref<1x32xf32, #tpu.memory_space<vmem>>, %arg3: memref<1x32xf32, #tpu.memory_space<vmem>>, %arg4: memref<16x32xf32, #tpu.memory_space<vmem>>) attributes {dimension_semantics = [#tpu.dimension_semantics<parallel>], iteration_bounds = array<i64: 1>, scalar_prefetch = 0 : i64, scratch_operands = 0 : i64, tpu.core_type = #tpu.core_type<tc>, window_params = [{transform_indices = @transform_0, window_bounds = array<i64: 16, 32>}, {pipeline_mode = #tpu.pipeline_mode<synchronous>, transform_indices = @transform_1, window_bounds = array<i64: 1, 32>}, {pipeline_mode = #tpu.pipeline_mode<synchronous>, transform_indices = @transform_2, window_bounds = array<i64: 1, 32>}, {transform_indices = @transform_3, window_bounds = array<i64: 16, 32>}]} {
    %c0 = arith.constant 0 : index
    %c0_0 = arith.constant 0 : index
    %0 = vector.load %arg1[%c0, %c0_0] : memref<16x32xf32, #tpu.memory_space<vmem>>, vector<16x32xf32>
    %cst = arith.constant dense<0.000000e+00> : vector<16xf32>
    %1 = vector.multi_reduction <add>, %0, %cst [1] : vector<16x32xf32> to vector<16xf32>
    %2 = vector.shape_cast %1 : vector<16xf32> to vector<16x1xf32>
    %3 = arith.mulf %0, %0 : vector<16x32xf32>
    %cst_1 = arith.constant dense<0.000000e+00> : vector<16xf32>
    %4 = vector.multi_reduction <add>, %3, %cst_1 [1] : vector<16x32xf32> to vector<16xf32>
    %5 = vector.shape_cast %4 : vector<16xf32> to vector<16x1xf32>
    %cst_2 = arith.constant 3.125000e-02 : f32
    %6 = vector.broadcast %cst_2 : f32 to vector<16x1xf32>
    %7 = arith.mulf %2, %6 : vector<16x1xf32>
    %8 = arith.mulf %2, %7 : vector<16x1xf32>
    %9 = arith.subf %5, %8 : vector<16x1xf32>
    %cst_3 = arith.constant 0.0322580636 : f32
    %10 = vector.broadcast %cst_3 : f32 to vector<16x1xf32>
    %11 = arith.mulf %9, %10 : vector<16x1xf32>
    %cst_4 = arith.constant 0.000000e+00 : f32
    %12 = vector.broadcast %cst_4 : f32 to vector<16x1xf32>
    %13 = arith.maximumf %11, %12 : vector<16x1xf32>
    %14 = math.sqrt %13 : vector<16x1xf32>
    %cst_5 = arith.constant 9.99999997E-7 : f32
    %15 = vector.broadcast %cst_5 : f32 to vector<16x1xf32>
    %16 = arith.addf %14, %15 : vector<16x1xf32>
    %17 = tpu.reciprocal %16 : vector<16x1xf32> -> vector<16x1xf32>
    %c0_6 = arith.constant 0 : index
    %c0_7 = arith.constant 0 : index
    %18 = vector.load %arg2[%c0_6, %c0_7] : memref<1x32xf32, #tpu.memory_space<vmem>>, vector<1x32xf32>
    %c0_8 = arith.constant 0 : index
    %c0_9 = arith.constant 0 : index
    %19 = vector.load %arg3[%c0_8, %c0_9] : memref<1x32xf32, #tpu.memory_space<vmem>>, vector<1x32xf32>
    %20 = vector.broadcast %7 : vector<16x1xf32> to vector<16x32xf32>
    %21 = arith.subf %0, %20 : vector<16x32xf32>
    %22 = vector.broadcast %17 : vector<16x1xf32> to vector<16x32xf32>
    %23 = arith.mulf %21, %22 : vector<16x32xf32>
    %24 = vector.broadcast %18 : vector<1x32xf32> to vector<16x32xf32>
    %25 = arith.mulf %23, %24 : vector<16x32xf32>
    %26 = vector.broadcast %19 : vector<1x32xf32> to vector<16x32xf32>
    %27 = arith.addf %25, %26 : vector<16x32xf32>
    %c0_10 = arith.constant 0 : index
    %c0_11 = arith.constant 0 : index
    %28 = vector.load %arg4[%c0_10, %c0_11] : memref<16x32xf32, #tpu.memory_space<vmem>>, vector<16x32xf32>
    tpu.vector_store %arg4[%c0_10, %c0_11], %27 {strides = array<i32>} : memref<16x32xf32, #tpu.memory_space<vmem>>, vector<16x32xf32>,
    return
  }
  func.func @transform_0(%arg0: i32) -> (i32, i32) {
    %c0_i32 = arith.constant 0 : i32
    %c0_i32_0 = arith.constant 0 : i32
    return %arg0, %c0_i32 : i32, i32
  }
  func.func @transform_1(%arg0: i32) -> (i32, i32) {
    %c0_i32 = arith.constant 0 : i32
    %c0_i32_0 = arith.constant 0 : i32
    %c0_i32_1 = arith.constant 0 : i32
    return %c0_i32, %c0_i32_0 : i32, i32
  }
  func.func @transform_2(%arg0: i32) -> (i32, i32) {
    %c0_i32 = arith.constant 0 : i32
    %c0_i32_0 = arith.constant 0 : i32
    %c0_i32_1 = arith.constant 0 : i32
    return %c0_i32, %c0_i32_0 : i32, i32
  }
  func.func @transform_3(%arg0: i32) -> (i32, i32) {
    %c0_i32 = arith.constant 0 : i32
    %c0_i32_0 = arith.constant 0 : i32
    return %arg0, %c0_i32 : i32, i32
  }
}

</mosaic_0001>

<bundles_post_ra>
// kernel: tpu_custom_call.1
= control target key start
LH: loop header
LB: loop body
LE: loop exit
PB: predicated region body
PF: predicated region fallthrough
CT: control target
= control target key end

     0   :  { %8 = vsyncpa [#allocation3], 0  ;;  %s243_s0 = inlined_call_operand.hbm [shape: f32[16,32], index: 0, kind: input, shape index: {}]   ;;  %s244_s1 = inlined_call_operand.vmem [shape: f32[1,32], index: 1, kind: input, shape index: {}]   ;;  %s245_s2 = inlined_call_operand.vmem [shape: f32[1,32], index: 2, kind: input, shape index: {}]   ;;  %s246_s3 = inlined_call_operand.hbm [shape: f32[16,32], index: 3, kind: output, shape index: {}]  }
   0x1   :  { %9 = vsyncpa [#allocation4], 0  ;;  %s177_s12 = smov [#allocation2]   ;;  %s129_s16 = scalar_lea.hbm %s243_s0, 256 }
   0x2   :  { %s15_s13 = sshll.u32 %s177_s12, 4  ;;  %p130_p0 = scmp.ne.s32.totalorder %s243_s0, %s129_s16  ;;  %s16_s13 = int_to_ptr.vmem [resolvable:$true] %s15_s13 }
   0x3   :  { %p133_p1 = scmp.lt.u32.totalorder %s129_s16, %s243_s0 }
   0x5   :  { %p135_p2 = pnand %p133_p1, %p130_p0 }
   0x7   :  { %138 = shalt.err (!%p135_p2)
}
   0x8   :  { %s139_s21 = scalar_lea.vmem %s16_s13, 256  ;;  %p144_p4 = scmp.lt.s32.totalorder %s16_s13, %s16_s13 }
   0x9   :  { %p140_p3 = scmp.ne.s32.totalorder %s16_s13, %s139_s21  ;;  %p145_p5 = scmp.lt.s32.totalorder %s139_s21, %s139_s21 }
   0xb   :  { %p146_p6 = por %p145_p5, %p144_p4 }
   0xd   :  { %p147_p7 = pnand %p146_p6, %p140_p3 }
   0xf   :  { %150 = shalt.err (!%p147_p7)
}
  0x10   :  { %s178_s22 = smov 128   ;;  %s179_s23 = smov 8  }
  0x11   :  { %21 = dma.hbm_to_vmem [thread:$0]  %s243_s0, 256, %s16_s13, [#allocation3], %s178_s22, %s178_s22, %s179_s23  }
  0x12   :  { %173 = dma.done.wait [#allocation3], 256  }
  0x13   :  { %174 = vsyncadd [#allocation3], 4294967040  ;;  %vm31_vm0 = vcmask 261120   ;;  %v29_v0 = vld [vmem:[#allocation2] sm:$0xff]  ;;  %v30_v1 = vld [vmem:[#allocation2 + $0x8] sm:$0xff]  ;;  %s180_s29 = smov [#allocation5]  }
  0x14   :  { %v32_v2 = vsel %vm31_vm0, %v29_v0, 0.0  ;;  %v38_v3 = vmul.f32 %v29_v0, %v29_v0  ;;  %v39_v4 = vmul.f32 %v30_v1, %v30_v1  ;;  %v35_v6 = vsel %vm31_vm0, %v30_v1, 0.0  ;;  %v115_v36 = vld [vmem:[%s244_s1] ss:$0 sm:$0xff]  ;;  %s103_s30 = sshll.u32 %s180_s29, 4  ;;  %s104_s30 = int_to_ptr.vmem [resolvable:$true] %s103_s30 }
  0x15   :  { %33 = vadd.xlane.f32.xlu0 %v32_v2  ;;  %v116_v38 = vld [vmem:[%s245_s2] ss:$0 sm:$0xff]  ;;  %s151_s1 = scalar_lea.vmem %s104_s30, 256  ;;  %p156_p9 = scmp.lt.s32.totalorder %s104_s30, %s104_s30 }
  0x16   :  { %v40_v5 = vsel %vm31_vm0, %v38_v3, 0.0  ;;  %v43_v7 = vsel %vm31_vm0, %v39_v4, 0.0  ;;  %p152_p8 = scmp.ne.s32.totalorder %s104_s30, %s151_s1  ;;  %p157_p10 = scmp.lt.s32.totalorder %s151_s1, %s151_s1 }
  0x17   :  { %41 = vadd.xlane.f32.xlu1 %v40_v5 }
  0x18   :  { %p158_p11 = por %p157_p10, %p156_p9 }
  0x19   :  { %36 = vadd.xlane.f32.xlu0 %v35_v6 }
  0x1a   :  { %p159_p12 = pnand %p158_p11, %p152_p8 }
  0x1b   :  { %44 = vadd.xlane.f32.xlu1 %v43_v7 }
  0xa2   :  { %v34_v8 = vpop.xlane.xlu0 %33 }
  0xa3   :  { %v46_v9 = vmul.f32 0.03125, %v34_v8 }
  0xa4   :  { %v42_v10 = vpop.xlane.xlu1 %41 }
  0xa5   :  { %v48_v11 = vmul.f32 %v46_v9, %v34_v8  ;;  %v76_v34 = vsub.f32 %v29_v0, %v46_v9 }
  0xa6   :  { %v37_v12 = vpop.xlane.xlu0 %36 }
  0xa7   :  { %v50_v13 = vsub.f32 %v42_v10, %v48_v11  ;;  %v47_v14 = vmul.f32 0.03125, %v37_v12 }
  0xa8   :  { %v45_v15 = vpop.xlane.xlu1 %44 }
  0xa9   :  { %v52_v16 = vmul.f32 0.032258064, %v50_v13  ;;  %v49_v17 = vmul.f32 %v47_v14, %v37_v12  ;;  %v77_v40 = vsub.f32 %v30_v1, %v47_v14 }
  0xab   :  { %v54_v18 = vmax.f32 %v52_v16, 0.0  ;;  %v51_v19 = vsub.f32 %v45_v15, %v49_v17 }
  0xad   :  { %121 = vrsqrt.f32 %v54_v18  ;;  %v53_v20 = vmul.f32 0.032258064, %v51_v19  ;;  %vm58_vm1 = vcmp.eq.f32.partialorder %v54_v18, inf  ;;  %v61_v24 = vand.u32 2147483648, %v54_v18 }
  0xae   :  { %vm60_vm2 = vcmp.eq.f32.partialorder %v54_v18, 0.0 }
  0xaf   :  { %v55_v21 = vmax.f32 %v53_v20, 0.0 }
  0xb1   :  { %123 = vrsqrt.f32 %v55_v21  ;;  %vm65_vm3 = vcmp.eq.f32.partialorder %v55_v21, inf  ;;  %v68_v30 = vand.u32 2147483648, %v55_v21  ;;  %vm67_vm4 = vcmp.eq.f32.partialorder %v55_v21, 0.0 }
  0xb7   :  { %v122_v22 = vpop.eup %121 }
  0xb8   :  { %v57_v23 = vmul.f32 %v122_v22, %v54_v18 }
  0xba   :  { %v59_v25 = vsel %vm58_vm1, %v54_v18, %v57_v23 }
  0xbb   :  { %v62_v26 = vsel %vm60_vm2, %v61_v24, %v59_v25  ;;  %v124_v27 = vpop.eup %123 }
  0xbc   :  { %v70_v28 = vadd.f32 1e-06, %v62_v26  ;;  %v64_v29 = vmul.f32 %v124_v27, %v55_v21 }
  0xbe   :  { %125 = vrcp.f32 %v70_v28  ;;  %v66_v31 = vsel %vm65_vm3, %v55_v21, %v64_v29 }
  0xbf   :  { %v69_v32 = vsel %vm67_vm4, %v68_v30, %v66_v31 }
  0xc0   :  { %v71_v33 = vadd.f32 1e-06, %v69_v32 }
  0xc2   :  { %127 = vrcp.f32 %v71_v33 }
  0xc8   :  { %v126_v35 = vpop.eup %125 }
  0xc9   :  { %v78_v37 = vmul.f32 %v126_v35, %v76_v34 }
  0xcb   :  { %v86_v39 = vmul.f32 %v115_v36, %v78_v37 }
  0xcc   :  { %v128_v41 = vpop.eup %127 }
  0xcd   :  { %v94_v42 = vadd.f32 %v116_v38, %v86_v39  ;;  %v79_v43 = vmul.f32 %v128_v41, %v77_v40 }
  0xcf   :  { %96 = vst.msk [vmem:[#allocation5] sm:$0xff] %vm31_vm0, %v94_v42  ;;  %v87_v44 = vmul.f32 %v115_v36, %v79_v43 }
  0xd1   :  { %v95_v45 = vadd.f32 %v116_v38, %v87_v44 }
  0xd3   :  { %97 = vst.msk [vmem:[#allocation5 + $0x8] sm:$0xff] %vm31_vm0, %v95_v45 }
  0xd4   :  { %162 = shalt.err (!%p159_p12)
}
  0xd5   :  { %s163_s5 = scalar_lea.hbm %s246_s3, 256 }
  0xd6   :  { %p164_p13 = scmp.ne.s32.totalorder %s246_s3, %s163_s5  ;;  %p167_p0 = scmp.lt.u32.totalorder %s163_s5, %s246_s3 }
  0xd8   :  { %p169_p1 = pnand %p167_p0, %p164_p13 }
  0xda   :  { %172 = shalt.err (!%p169_p1)
}
  0xdb   :  { %109 = dma.vmem_to_hbm [thread:$0]  %s104_s30, 256, %s246_s3, [#allocation4], %s178_s22, %s178_s22, %s179_s23  }
  0xdc   :  { %175 = dma.done.wait [#allocation4], 256  }
  0xdd   :  { %176 = vsyncadd [#allocation4], 4294967040 }
  0xde   :  { %113 = vsyncpa [#allocation3], 1 }
  0xdf   :  { %114 = vsyncpa [#allocation4], 1 }

</bundles_post_ra>
